<compile_context>
chip_gen: v5e
topology: v5e:2x2
jax: 0.10.0
libtpu: 0.0.40
codegen_flags: <defaults>
</compile_context>

<pallas_src>
import jax
import jax.numpy as jnp
from jax.experimental import pallas as pl
from jax.experimental.pallas import tpu as pltpu

INPUT_SIZE = 9
HIDDEN_SIZE = 100
NUM_CLASSES = 2

HIDDEN_PAD = 128   # hidden 100 -> 128 (lane aligned; do NOT pad further, MXU
                   # under-utilization at K=N=128 is inherent to hidden=100)
OUT_PAD = 128      # w4/b4 padded columns: clean MXU tile; only 2 lanes stored


def _round_up(n, m):
    return ((n + m - 1) // m) * m


def _mlp_kernel(x_ref,
                w1_ref, b1_ref,
                w2_ref, b2_ref,
                w3_ref, b3_ref,
                w4_ref, b4_ref,
                o_ref):
    # MXU inputs in bf16, accumulation + bias-add + ReLU in f32.
    x = x_ref[...].astype(jnp.bfloat16)                                # (TB, 9)

    # linear1 + relu  (K=9 -> N=128)
    h = jnp.dot(x, w1_ref[...], preferred_element_type=jnp.float32) + b1_ref[...]
    h = jnp.maximum(h, 0.0)

    # linear2 + relu  (128 x 128)
    h = jnp.dot(h.astype(jnp.bfloat16), w2_ref[...],
                preferred_element_type=jnp.float32) + b2_ref[...]
    h = jnp.maximum(h, 0.0)

    # linear3 + relu  (128 x 128)
    h = jnp.dot(h.astype(jnp.bfloat16), w3_ref[...],
                preferred_element_type=jnp.float32) + b3_ref[...]
    h = jnp.maximum(h, 0.0)

    # linear4 (no activation); padded columns of w4/b4 are zero.
    out = jnp.dot(h.astype(jnp.bfloat16), w4_ref[...],
                  preferred_element_type=jnp.float32) + b4_ref[...]    # (TB, 128)

    # Store only the real class lanes. The masked 2-lane vst is trivially
    # hidden under the 4 matmuls and cuts HBM writeback by 64x.
    o_ref[...] = out[:, :NUM_CLASSES].astype(o_ref.dtype)              # (TB, 2)


def pad_params(params):
    """Zero-pad raw (in,out)/(1,out) params to lane-aligned shapes.

    Weights are stored in bf16 (MXU inputs); biases stay f32 (added after the
    f32-accumulated dot). Do this once and reuse across calls.
    """
    def pad_to(a, rows, cols, dtype):
        r, c = a.shape
        return jnp.pad(a, ((0, rows - r), (0, cols - c))).astype(dtype)

    return dict(
        w1=pad_to(params["w1"], INPUT_SIZE, HIDDEN_PAD, jnp.bfloat16),
        b1=pad_to(params["b1"], 1, HIDDEN_PAD, jnp.float32),
        w2=pad_to(params["w2"], HIDDEN_PAD, HIDDEN_PAD, jnp.bfloat16),
        b2=pad_to(params["b2"], 1, HIDDEN_PAD, jnp.float32),
        w3=pad_to(params["w3"], HIDDEN_PAD, HIDDEN_PAD, jnp.bfloat16),
        b3=pad_to(params["b3"], 1, HIDDEN_PAD, jnp.float32),
        w4=pad_to(params["w4"], HIDDEN_PAD, OUT_PAD, jnp.bfloat16),
        b4=pad_to(params["b4"], 1, OUT_PAD, jnp.float32),
    )


def _choose_tile(batch, tile_batch):
    """Adaptive batch tile: big enough to amortize per-step overhead, >=2 tiles
    for medium/large batches (v7x megacore), and minimal batch-pad waste."""
    n_tiles = max(1, pl.cdiv(batch, tile_batch))
    if batch > 256:
        n_tiles = max(n_tiles, 2)          # both v7x TensorCores engage
    return _round_up(pl.cdiv(batch, n_tiles), 8)


def neural_net_links_forward(x, padded_params, tile_batch=2048):
    """x: (B, INPUT_SIZE) f32. padded_params: output of pad_params()."""
    B = x.shape[0]

    tb = _choose_tile(B, tile_batch)
    b_pad = _round_up(B, tb)
    if b_pad != B:
        x = jnp.pad(x, ((0, b_pad - B), (0, 0)))
    num_tiles = b_pad // tb

    p = padded_params
    args = (x, p["w1"], p["b1"], p["w2"], p["b2"],
            p["w3"], p["b3"], p["w4"], p["b4"])

    # x is tiled along the batch; weights/biases use constant-index blocks so
    # they are DMA'd once and stay resident in VMEM for the whole grid.
    x_spec = pl.BlockSpec((tb, INPUT_SIZE), lambda i: (i, 0))
    const_spec = lambda a: pl.BlockSpec(a.shape, lambda i: (0, 0))
    in_specs = [x_spec] + [const_spec(a) for a in args[1:]]
    out_spec = pl.BlockSpec((tb, NUM_CLASSES), lambda i: (i, 0))

    flops = 2 * b_pad * (INPUT_SIZE * HIDDEN_PAD
                         + 2 * HIDDEN_PAD * HIDDEN_PAD
                         + HIDDEN_PAD * OUT_PAD)
    param_bytes = sum(int(a.size) * a.dtype.itemsize for a in args[1:])
    bytes_accessed = b_pad * (INPUT_SIZE * 4 + NUM_CLASSES * 4) + param_bytes

    out = pl.pallas_call(
        _mlp_kernel,
        out_shape=jax.ShapeDtypeStruct((b_pad, NUM_CLASSES), jnp.float32),
        grid=(num_tiles,),
        in_specs=in_specs,
        out_specs=out_spec,
        compiler_params=pltpu.CompilerParams(
            dimension_semantics=("parallel",)),
        cost_estimate=pl.CostEstimate(
            flops=flops, transcendentals=0, bytes_accessed=bytes_accessed),
    )(*args)

    return out[:B] if b_pad != B else out


def init_params(key):
    """Deterministic init mimicking PyTorch nn.Linear default
    (uniform(-1/sqrt(fan_in), 1/sqrt(fan_in)))."""
    def linear(key, fan_in, fan_out):
        kw, kb = jax.random.split(key)
        bound = 1.0 / jnp.sqrt(jnp.float32(fan_in))
        w = jax.random.uniform(kw, (fan_in, fan_out), jnp.float32, -bound, bound)
        b = jax.random.uniform(kb, (1, fan_out), jnp.float32, -bound, bound)
        return w, b

    k1, k2, k3, k4 = jax.random.split(key, 4)
    w1, b1 = linear(k1, INPUT_SIZE, HIDDEN_SIZE)
    w2, b2 = linear(k2, HIDDEN_SIZE, HIDDEN_SIZE)
    w3, b3 = linear(k3, HIDDEN_SIZE, HIDDEN_SIZE)
    w4, b4 = linear(k4, HIDDEN_SIZE, NUM_CLASSES)
    return dict(w1=w1, b1=b1, w2=w2, b2=b2, w3=w3, b3=b3, w4=w4, b4=b4)


def _reference(x, p):
    h = jnp.maximum(x @ p["w1"] + p["b1"], 0.0)
    h = jnp.maximum(h @ p["w2"] + p["b2"], 0.0)
    h = jnp.maximum(h @ p["w3"] + p["b3"], 0.0)
    return h @ p["w4"] + p["b4"]


if __name__ == "__main__":
    key = jax.random.PRNGKey(0)
    k_params, k_x = jax.random.split(key)
    params = init_params(k_params)
    padded = pad_params(params)   # pad + bf16-cast once; reuse across calls

    batch = 8
    x = jax.random.normal(k_x, (batch, INPUT_SIZE), jnp.float32)

    out = neural_net_links_forward(x, padded)
    out = jax.block_until_ready(out)

    ref = _reference(x, params)
    assert out.shape == (batch, NUM_CLASSES)
    # bf16 MXU inputs with f32 accumulation -> relaxed tolerance vs f32 ref.
    assert jnp.allclose(out, ref, atol=3e-2, rtol=3e-2), "mismatch vs reference"

    # Also exercise the multi-tile / ragged-batch path (2 tiles, padded rows).
    big_b = 1030
    xb = jax.random.normal(jax.random.PRNGKey(1), (big_b, INPUT_SIZE), jnp.float32)
    out_b = jax.block_until_ready(neural_net_links_forward(xb, padded))
    ref_b = _reference(xb, params)
    assert out_b.shape == (big_b, NUM_CLASSES)
    assert jnp.allclose(out_b, ref_b, atol=3e-2, rtol=3e-2), "mismatch vs reference (big)"

    print("KERNEL_OK")
</pallas_src>

<mosaic_0001>
module attributes {stable_mosaic.version = 11 : i64} {
  func.func @_mlp_kernel(%arg0: i32, %arg1: memref<8x9xf32, #tpu.memory_space<vmem>>, %arg2: memref<9x128xbf16, #tpu.memory_space<vmem>>, %arg3: memref<1x128xf32, #tpu.memory_space<vmem>>, %arg4: memref<128x128xbf16, #tpu.memory_space<vmem>>, %arg5: memref<1x128xf32, #tpu.memory_space<vmem>>, %arg6: memref<128x128xbf16, #tpu.memory_space<vmem>>, %arg7: memref<1x128xf32, #tpu.memory_space<vmem>>, %arg8: memref<128x128xbf16, #tpu.memory_space<vmem>>, %arg9: memref<1x128xf32, #tpu.memory_space<vmem>>, %arg10: memref<8x2xf32, #tpu.memory_space<vmem>>) attributes {dimension_semantics = [#tpu.dimension_semantics<parallel>], iteration_bounds = array<i64: 1>, scalar_prefetch = 0 : i64, scratch_operands = 0 : i64, tpu.core_type = #tpu.core_type<tc>, window_params = [{transform_indices = @transform_0, window_bounds = array<i64: 8, 9>}, {pipeline_mode = #tpu.pipeline_mode<synchronous>, transform_indices = @transform_1, window_bounds = array<i64: 9, 128>}, {pipeline_mode = #tpu.pipeline_mode<synchronous>, transform_indices = @transform_2, window_bounds = array<i64: 1, 128>}, {pipeline_mode = #tpu.pipeline_mode<synchronous>, transform_indices = @transform_3, window_bounds = array<i64: 128, 128>}, {pipeline_mode = #tpu.pipeline_mode<synchronous>, transform_indices = @transform_4, window_bounds = array<i64: 1, 128>}, {pipeline_mode = #tpu.pipeline_mode<synchronous>, transform_indices = @transform_5, window_bounds = array<i64: 128, 128>}, {pipeline_mode = #tpu.pipeline_mode<synchronous>, transform_indices = @transform_6, window_bounds = array<i64: 1, 128>}, {pipeline_mode = #tpu.pipeline_mode<synchronous>, transform_indices = @transform_7, window_bounds = array<i64: 128, 128>}, {pipeline_mode = #tpu.pipeline_mode<synchronous>, transform_indices = @transform_8, window_bounds = array<i64: 1, 128>}, {transform_indices = @transform_9, window_bounds = array<i64: 8, 2>}]} {
    %c0 = arith.constant 0 : index
    %c0_0 = arith.constant 0 : index
    %0 = vector.load %arg1[%c0, %c0_0] : memref<8x9xf32, #tpu.memory_space<vmem>>, vector<8x9xf32>
    %1 = arith.truncf %0 : vector<8x9xf32> to vector<8x9xbf16>
    %c0_1 = arith.constant 0 : index
    %c0_2 = arith.constant 0 : index
    %2 = vector.load %arg2[%c0_1, %c0_2] : memref<9x128xbf16, #tpu.memory_space<vmem>>, vector<9x128xbf16>
    %cst = arith.constant dense<0.000000e+00> : vector<8x128xf32>
    %3 = tpu.matmul %1, %2, %cst {dimension_numbers = #tpu.dot_dimension_numbers<[1], [0], [0], [1], [0, 0, 1, 1], [], []>} : vector<8x9xbf16>, vector<9x128xbf16>, vector<8x128xf32> -> vector<8x128xf32>
    %c0_3 = arith.constant 0 : index
    %c0_4 = arith.constant 0 : index
    %4 = vector.load %arg3[%c0_3, %c0_4] : memref<1x128xf32, #tpu.memory_space<vmem>>, vector<1x128xf32>
    %5 = vector.broadcast %4 : vector<1x128xf32> to vector<8x128xf32>
    %6 = arith.addf %3, %5 : vector<8x128xf32>
    %cst_5 = arith.constant 0.000000e+00 : f32
    %7 = vector.broadcast %cst_5 : f32 to vector<8x128xf32>
    %8 = arith.maximumf %6, %7 : vector<8x128xf32>
    %9 = arith.truncf %8 : vector<8x128xf32> to vector<8x128xbf16>
    %c0_6 = arith.constant 0 : index
    %c0_7 = arith.constant 0 : index
    %10 = vector.load %arg4[%c0_6, %c0_7] : memref<128x128xbf16, #tpu.memory_space<vmem>>, vector<128x128xbf16>
    %cst_8 = arith.constant dense<0.000000e+00> : vector<8x128xf32>
    %11 = tpu.matmul %9, %10, %cst_8 {dimension_numbers = #tpu.dot_dimension_numbers<[1], [0], [0], [1], [0, 0, 1, 1], [], []>} : vector<8x128xbf16>, vector<128x128xbf16>, vector<8x128xf32> -> vector<8x128xf32>
    %c0_9 = arith.constant 0 : index
    %c0_10 = arith.constant 0 : index
    %12 = vector.load %arg5[%c0_9, %c0_10] : memref<1x128xf32, #tpu.memory_space<vmem>>, vector<1x128xf32>
    %13 = vector.broadcast %12 : vector<1x128xf32> to vector<8x128xf32>
    %14 = arith.addf %11, %13 : vector<8x128xf32>
    %cst_11 = arith.constant 0.000000e+00 : f32
    %15 = vector.broadcast %cst_11 : f32 to vector<8x128xf32>
    %16 = arith.maximumf %14, %15 : vector<8x128xf32>
    %17 = arith.truncf %16 : vector<8x128xf32> to vector<8x128xbf16>
    %c0_12 = arith.constant 0 : index
    %c0_13 = arith.constant 0 : index
    %18 = vector.load %arg6[%c0_12, %c0_13] : memref<128x128xbf16, #tpu.memory_space<vmem>>, vector<128x128xbf16>
    %cst_14 = arith.constant dense<0.000000e+00> : vector<8x128xf32>
    %19 = tpu.matmul %17, %18, %cst_14 {dimension_numbers = #tpu.dot_dimension_numbers<[1], [0], [0], [1], [0, 0, 1, 1], [], []>} : vector<8x128xbf16>, vector<128x128xbf16>, vector<8x128xf32> -> vector<8x128xf32>
    %c0_15 = arith.constant 0 : index
    %c0_16 = arith.constant 0 : index
    %20 = vector.load %arg7[%c0_15, %c0_16] : memref<1x128xf32, #tpu.memory_space<vmem>>, vector<1x128xf32>
    %21 = vector.broadcast %20 : vector<1x128xf32> to vector<8x128xf32>
    %22 = arith.addf %19, %21 : vector<8x128xf32>
    %cst_17 = arith.constant 0.000000e+00 : f32
    %23 = vector.broadcast %cst_17 : f32 to vector<8x128xf32>
    %24 = arith.maximumf %22, %23 : vector<8x128xf32>
    %25 = arith.truncf %24 : vector<8x128xf32> to vector<8x128xbf16>
    %c0_18 = arith.constant 0 : index
    %c0_19 = arith.constant 0 : index
    %26 = vector.load %arg8[%c0_18, %c0_19] : memref<128x128xbf16, #tpu.memory_space<vmem>>, vector<128x128xbf16>
    %cst_20 = arith.constant dense<0.000000e+00> : vector<8x128xf32>
    %27 = tpu.matmul %25, %26, %cst_20 {dimension_numbers = #tpu.dot_dimension_numbers<[1], [0], [0], [1], [0, 0, 1, 1], [], []>} : vector<8x128xbf16>, vector<128x128xbf16>, vector<8x128xf32> -> vector<8x128xf32>
    %c0_21 = arith.constant 0 : index
    %c0_22 = arith.constant 0 : index
    %28 = vector.load %arg9[%c0_21, %c0_22] : memref<1x128xf32, #tpu.memory_space<vmem>>, vector<1x128xf32>
    %29 = vector.broadcast %28 : vector<1x128xf32> to vector<8x128xf32>
    %30 = arith.addf %27, %29 : vector<8x128xf32>
    %31 = vector.extract_strided_slice %30 {offsets = [0, 0], sizes = [8, 2], strides = [1, 1]} : vector<8x128xf32> to vector<8x2xf32>
    %c0_23 = arith.constant 0 : index
    %c0_24 = arith.constant 0 : index
    %32 = vector.load %arg10[%c0_23, %c0_24] : memref<8x2xf32, #tpu.memory_space<vmem>>, vector<8x2xf32>
    tpu.vector_store %arg10[%c0_23, %c0_24], %31 {strides = array<i32>} : memref<8x2xf32, #tpu.memory_space<vmem>>, vector<8x2xf32>,
    return
  }
  func.func @transform_0(%arg0: i32) -> (i32, i32) {
    %c0_i32 = arith.constant 0 : i32
    %c0_i32_0 = arith.constant 0 : i32
    return %arg0, %c0_i32 : i32, i32
  }
  func.func @transform_1(%arg0: i32) -> (i32, i32) {
    %c0_i32 = arith.constant 0 : i32
    %c0_i32_0 = arith.constant 0 : i32
    %c0_i32_1 = arith.constant 0 : i32
    return %c0_i32, %c0_i32_0 : i32, i32
  }
  func.func @transform_2(%arg0: i32) -> (i32, i32) {
    %c0_i32 = arith.constant 0 : i32
    %c0_i32_0 = arith.constant 0 : i32
    %c0_i32_1 = arith.constant 0 : i32
    return %c0_i32, %c0_i32_0 : i32, i32
  }
  func.func @transform_3(%arg0: i32) -> (i32, i32) {
    %c0_i32 = arith.constant 0 : i32
    %c0_i32_0 = arith.constant 0 : i32
    %c0_i32_1 = arith.constant 0 : i32
    return %c0_i32, %c0_i32_0 : i32, i32
  }
  func.func @transform_4(%arg0: i32) -> (i32, i32) {
    %c0_i32 = arith.constant 0 : i32
    %c0_i32_0 = arith.constant 0 : i32
    %c0_i32_1 = arith.constant 0 : i32
    return %c0_i32, %c0_i32_0 : i32, i32
  }
  func.func @transform_5(%arg0: i32) -> (i32, i32) {
    %c0_i32 = arith.constant 0 : i32
    %c0_i32_0 = arith.constant 0 : i32
    %c0_i32_1 = arith.constant 0 : i32
    return %c0_i32, %c0_i32_0 : i32, i32
  }
  func.func @transform_6(%arg0: i32) -> (i32, i32) {
    %c0_i32 = arith.constant 0 : i32
    %c0_i32_0 = arith.constant 0 : i32
    %c0_i32_1 = arith.constant 0 : i32
    return %c0_i32, %c0_i32_0 : i32, i32
  }
  func.func @transform_7(%arg0: i32) -> (i32, i32) {
    %c0_i32 = arith.constant 0 : i32
    %c0_i32_0 = arith.constant 0 : i32
    %c0_i32_1 = arith.constant 0 : i32
    return %c0_i32, %c0_i32_0 : i32, i32
  }
  func.func @transform_8(%arg0: i32) -> (i32, i32) {
    %c0_i32 = arith.constant 0 : i32
    %c0_i32_0 = arith.constant 0 : i32
    %c0_i32_1 = arith.constant 0 : i32
    return %c0_i32, %c0_i32_0 : i32, i32
  }
  func.func @transform_9(%arg0: i32) -> (i32, i32) {
    %c0_i32 = arith.constant 0 : i32
    %c0_i32_0 = arith.constant 0 : i32
    return %arg0, %c0_i32 : i32, i32
  }
}

</mosaic_0001>

<bundles_post_ra>
// kernel: tpu_custom_call.1
= control target key start
LH: loop header
LB: loop body
LE: loop exit
PB: predicated region body
PF: predicated region fallthrough
CT: control target
= control target key end

     0   :  { %14 = vsyncpa [#allocation3], 0  ;;  %s756_s0 = inlined_call_operand.hbm [shape: f32[8,9], index: 0, kind: input, shape index: {}]   ;;  %s757_s1 = inlined_call_operand.hbm [shape: bf16[9,128], index: 1, kind: input, shape index: {}]   ;;  %s758_s2 = inlined_call_operand.vmem [shape: f32[1,128], index: 2, kind: input, shape index: {}]   ;;  %s759_s3 = inlined_call_operand.hbm [shape: bf16[128,128], index: 3, kind: input, shape index: {}]   ;;  %s760_s4 = inlined_call_operand.vmem [shape: f32[1,128], index: 4, kind: input, shape index: {}]   ;;  %s761_s5 = inlined_call_operand.hbm [shape: bf16[128,128], index: 5, kind: input, shape index: {}]   ;;  %s762_s6 = inlined_call_operand.vmem [shape: f32[1,128], index: 6, kind: input, shape index: {}]   ;;  %s763_s7 = inlined_call_operand.hbm [shape: bf16[128,128], index: 7, kind: input, shape index: {}]   ;;  %s764_s8 = inlined_call_operand.vmem [shape: f32[1,128], index: 8, kind: input, shape index: {}]   ;;  %s765_s9 = inlined_call_operand.vmem [shape: f32[8,2], index: 9, kind: output, shape index: {}]  }
   0x1   :  { %15 = vsyncpa [#allocation5], 0  ;;  %s32_s11 = sshll.u32 %s757_s1, 4  ;;  %s33_s11 = int_to_ptr.hbm [resolvable:$true] %s32_s11 }
   0x2   :  { %16 = vsyncpa [#allocation8], 0  ;;  %s668_s12 = smov [#allocation4]   ;;  %s62_s16 = sshll.u32 %s761_s5, 4  ;;  %s63_s16 = int_to_ptr.hbm [resolvable:$true] %s62_s16 }
   0x3   :  { %s34_s13 = sshll.u32 %s668_s12, 4  ;;  %s669_s17 = smov 64   ;;  %s35_s13 = int_to_ptr.vmem [resolvable:$true] %s34_s13 }
   0x4   :  { %s670_s18 = smov 4   ;;  %s671_s19 = smov [#allocation7]  }
   0x5   :  { %40 = dma.hbm_to_vmem [thread:$0]  %s33_s11, 128, %s35_s13, [#allocation5], %s669_s17, %s669_s17, %s670_s18  }
   0x6   :  { %s64_s20 = sshll.u32 %s671_s19, 4  ;;  %s22_s23 = sshll.u32 %s756_s0, 4  ;;  %s65_s20 = int_to_ptr.vmem [resolvable:$true] %s64_s20  ;;  %s23_s23 = int_to_ptr.hbm [resolvable:$true] %s22_s23 }
   0x7   :  { %70 = dma.hbm_to_vmem [thread:$0]  %s63_s16, 1024, %s65_s20, [#allocation8], %s669_s17, %s669_s17, %s670_s18  }
   0x8   :  { %s47_s25 = sshll.u32 %s759_s3, 4  ;;  %s672_s26 = smov [#allocation2]   ;;  %s48_s25 = int_to_ptr.hbm [resolvable:$true] %s47_s25 }
   0x9   :  { %s24_s27 = sshll.u32 %s672_s26, 4  ;;  %s673_s5 = smov [#allocation6]   ;;  %s25_s27 = int_to_ptr.vmem [resolvable:$true] %s24_s27 }
   0xa   :  { %27 = dma.hbm_to_vmem [thread:$0]  %s23_s23, 128, %s25_s27, [#allocation3]  }
   0xb   :  { %s49_s28 = sshll.u32 %s673_s5, 4  ;;  %s77_s10 = sshll.u32 %s763_s7, 4  ;;  %s50_s28 = int_to_ptr.vmem [resolvable:$true] %s49_s28  ;;  %s78_s10 = int_to_ptr.hbm [resolvable:$true] %s77_s10 }
   0xc   :  { %55 = dma.hbm_to_vmem [thread:$0]  %s48_s25, 1024, %s50_s28, [#allocation5], %s669_s17, %s669_s17, %s670_s18  }
   0xd   :  { %s674_s0 = smov [#allocation9]  }
   0xe   :  { %s79_s11 = sshll.u32 %s674_s0, 4  ;;  %s80_s11 = int_to_ptr.vmem [resolvable:$true] %s79_s11 }
   0xf   :  { %85 = dma.hbm_to_vmem [thread:$0]  %s78_s10, 1024, %s80_s11, [#allocation8], %s669_s17, %s669_s17, %s670_s18  }
  0x10   :  { %662 = dma.done.wait [#allocation3], 128  }
  0x11   :  { %663 = vsyncadd [#allocation3], 4294967168 }
  0x12   :  { %664 = dma.done.wait [#allocation5], 1152  }
  0x13   :  { %665 = vsyncadd [#allocation5], 4294966144 }
  0x14   :  { %666 = dma.done.wait [#allocation8], 2048  }
  0x15   :  { %667 = vsyncadd [#allocation8], 4294965248  ;;  %vm126_vm0 = vcmask 1043456   ;;  %vm127_vm1 = vcmask 1044480   ;;  %v675_v0 = vmov 65535   ;;  %v109_v6 = vld [vmem:[#allocation2] sm:$0xff] }
  0x16   :  { %v128_v1 = vsel %vm126_vm0, 4294967295, %v675_v0  ;;  %v406_v2 = vld [vmem:[#allocation4] sm:$0xf]  ;;  %v505_v3 = vld [vmem:[#allocation4] sm:$0x10]  ;;  %v512_v9 = vld [vmem:[#allocation6 + $0x30] sm:$0xff]  ;;  %v110_v10 = vpack.c.bf16 %v109_v6, %v109_v6 }
  0x17   :  { %v129_v4 = vsel %vm127_vm1, %v128_v1, 0  ;;  %v407_v5 = vor.u32 %v505_v3, %v406_v2  ;;  %v513_v7 = vld [vmem:[#allocation6 + $0x38] sm:$0xff]  ;;  %vm122_vm2 = vcmask 72704   ;;  %v511_v11 = vld [vmem:[#allocation6 + $0x28] sm:$0xff]  ;;  %v510_v12 = vld [vmem:[#allocation6 + $0x20] sm:$0xff]  ;;  %vm395_vm3 = vcmask 15360  }
  0x18   :  { %216 = vmatpush.bf16.msra.mxu1 %v513_v7  ;;  %v509_v13 = vld [vmem:[#allocation6 + $0x18] sm:$0xff]  ;;  %v508_v14 = vld [vmem:[#allocation6 + $0x10] sm:$0xff]  ;;  %v507_v15 = vld [vmem:[#allocation6 + $0x8] sm:$0xff] }
  0x19   :  { %v131_v8 = vand.u32 %v407_v5, %v129_v4  ;;  %v506_v16 = vld [vmem:[#allocation6] sm:$0xff]  ;;  %v521_v17 = vld [vmem:[#allocation7 + $0x38] sm:$0xff]  ;;  %v520_v18 = vld [vmem:[#allocation7 + $0x30] sm:$0xff] }
  0x1a   :  { %299 = vmatpush.bf16.msra.mxu2 %v521_v17  ;;  %v519_v19 = vld [vmem:[#allocation7 + $0x28] sm:$0xff]  ;;  %v518_v20 = vld [vmem:[#allocation7 + $0x20] sm:$0xff]  ;;  %v517_v21 = vld [vmem:[#allocation7 + $0x18] sm:$0xff] }
  0x1b   :  { %140 = vmatpush.bf16.msra.mxu0 %v131_v8  ;;  %v516_v22 = vld [vmem:[#allocation7 + $0x10] sm:$0xff]  ;;  %v515_v29 = vld [vmem:[#allocation7 + $0x8] sm:$0xff]  ;;  %v514_v30 = vld [vmem:[#allocation7] sm:$0xff] }
  0x1c   :  { %217 = vmatpush.bf16.msra.mxu1 %v512_v9  ;;  %v538_v23 = vld [vmem:[%s758_s2] ss:$0 sm:$0xff]  ;;  %v529_v31 = vld [vmem:[#allocation9 + $0x38] sm:$0xff]  ;;  %v527_v33 = vld [vmem:[#allocation9 + $0x28] sm:$0xff] }
  0x1d   :  { %382 = vmatpush.bf16.msra.mxu3 %v529_v31  ;;  %v528_v32 = vld [vmem:[#allocation9 + $0x30] sm:$0xff]  ;;  %v526_v34 = vld [vmem:[#allocation9 + $0x20] sm:$0xff]  ;;  %v525_v35 = vld [vmem:[#allocation9 + $0x18] sm:$0xff] }
  0x1e   :  { %408 = vmatmul.msk.bf16.vlgmr.msra.gmra.mxu0 %vm122_vm2, %v110_v10  ;;  %300 = vmatpush.bf16.msra.mxu2 %v520_v18  ;;  %v524_v36 = vld [vmem:[#allocation9 + $0x10] sm:$0xff]  ;;  %v523_v43 = vld [vmem:[#allocation9 + $0x8] sm:$0xff]  ;;  %v522_v44 = vld [vmem:[#allocation9] sm:$0xff] }
  0x1f   :  { %v539_v37 = vld [vmem:[%s760_s4] ss:$0 sm:$0xff] }
  0x20   :  { %218 = vmatpush.bf16.msra.mxu1 %v511_v11  ;;  %v540_v45 = vld [vmem:[%s762_s6] ss:$0 sm:$0xff] }
  0x21   :  { %383 = vmatpush.bf16.msra.mxu3 %v528_v32  ;;  %v541_v51 = vld [vmem:[%s764_s8] ss:$0 sm:$0xff] }
  0x22   :  { %301 = vmatpush.bf16.msra.mxu2 %v519_v19 }
  0x24   :  { %219 = vmatpush.bf16.msra.mxu1 %v510_v12 }
  0x25   :  { %384 = vmatpush.bf16.msra.mxu3 %v527_v33 }
  0x26   :  { %302 = vmatpush.bf16.msra.mxu2 %v518_v20 }
  0x28   :  { %220 = vmatpush.bf16.msra.mxu1 %v509_v13 }
  0x29   :  { %385 = vmatpush.bf16.msra.mxu3 %v526_v34 }
  0x2a   :  { %303 = vmatpush.bf16.msra.mxu2 %v517_v21 }
  0x2c   :  { %221 = vmatpush.bf16.msra.mxu1 %v508_v14 }
  0x2d   :  { %386 = vmatpush.bf16.msra.mxu3 %v525_v35 }
  0x2e   :  { %304 = vmatpush.bf16.msra.mxu2 %v516_v22 }
  0x30   :  { %222 = vmatpush.bf16.msra.mxu1 %v507_v15 }
  0x31   :  { %387 = vmatpush.bf16.msra.mxu3 %v524_v36 }
  0x32   :  { %305 = vmatpush.bf16.msra.mxu2 %v515_v29 }
  0x34   :  { %223 = vmatpush.bf16.msra.mxu1 %v506_v16 }
  0x35   :  { %388 = vmatpush.bf16.msra.mxu3 %v523_v43 }
  0x36   :  { %306 = vmatpush.bf16.msra.mxu2 %v514_v30 }
  0x39   :  { %389 = vmatpush.bf16.msra.mxu3 %v522_v44 }
  0x9b   :  { %v142_v24 = vpop.f32.mrf.mxu0 }
  0x9c   :  { %v143_v25 = vadd.f32 %v538_v23, %v142_v24 }
  0x9e   :  { %v146_v26 = vmax.f32 %v143_v25, 0.0 }
  0xa0   :  { %v147_v27 = vpack.c.bf16 %v146_v26, %v146_v26 }
  0xa2   :  { %224 = vmatmul.bf16.vlgmr.msra.gmra.mxu1 %v147_v27 }
  0xa3   :  { %v144_v28 = vpop.f32.mrf.mxu0 }
 0x11f   :  { %v225_v38 = vpop.f32.mrf.mxu1 }
 0x120   :  { %v226_v39 = vadd.f32 %v539_v37, %v225_v38 }
 0x122   :  { %v229_v40 = vmax.f32 %v226_v39, 0.0 }
 0x124   :  { %v230_v41 = vpack.c.bf16 %v229_v40, %v229_v40 }
 0x126   :  { %307 = vmatmul.bf16.vlgmr.msra.gmra.mxu2 %v230_v41 }
 0x127   :  { %v227_v42 = vpop.f32.mrf.mxu1 }
 0x1a9   :  { %v308_v46 = vpop.f32.mrf.mxu2 }
 0x1aa   :  { %v309_v47 = vadd.f32 %v540_v45, %v308_v46 }
 0x1ac   :  { %v312_v48 = vmax.f32 %v309_v47, 0.0 }
 0x1ae   :  { %v313_v49 = vpack.c.bf16 %v312_v48, %v312_v48 }
 0x1b0   :  { %390 = vmatmul.bf16.vlgmr.msra.gmra.mxu3 %v313_v49 }
 0x1b1   :  { %v310_v50 = vpop.f32.mrf.mxu2 }
 0x233   :  { %v391_v52 = vpop.f32.mrf.mxu3 }
 0x234   :  { %v392_v53 = vadd.f32 %v541_v51, %v391_v52 }
 0x236   :  { %396 = vst.msk [vmem:[%s765_s9] sm:$0xff] %vm395_vm3, %v392_v53 }
 0x23b   :  { %v393_v54 = vpop.f32.mrf.mxu3 }
 0x23c   :  { %401 = vsyncpa [#allocation3], 1 }
 0x23d   :  { %402 = vsyncpa [#allocation5], 1 }
 0x23e   :  { %403 = vsyncpa [#allocation8], 1 }

</bundles_post_ra>
